<compile_context>
chip_gen: v5e
topology: v5e:2x2
jax: 0.10.0
libtpu: 0.0.40
codegen_flags: <defaults>
</compile_context>

<pallas_src>
import functools

import jax
import jax.numpy as jnp
from jax.experimental import pallas as pl
from jax.experimental.pallas import tpu as pltpu


def _cdiv(a, b):
    return -(-a // b)


def _round_up(x, m):
    return ((x + m - 1) // m) * m


def _pow_int(x, n):
    """x**n for integer n >= 1 via exponentiation-by-squaring (VPU multiplies
    only: keeps the EUP free and matches torch's signed result for negative
    bases, unlike exp(n*log|x|))."""
    result = None
    base = x
    while n > 0:
        if n & 1:
            result = base if result is None else result * base
        n >>= 1
        if n:
            base = base * base
    return result


def _normalize_kernel(x_ref, o_ref, *, power):
    # x_ref / o_ref: (tile_rows, D) VMEM tiles. All math in f32.
    x = x_ref[...].astype(jnp.float32)
    p = float(power)
    if p == 2.0:
        # Hot path: sum of squares + rsqrt (one EUP op per row).
        inv_norm = jax.lax.rsqrt(jnp.sum(x * x, axis=1, keepdims=True))
    else:
        if p > 0.0 and p.is_integer():
            xp = _pow_int(x, int(p))
        else:
            # TODO(synk): non-integer powers fall back to exp/log like torch's
            # float-exponent pow (NaN for negative bases).
            xp = jnp.power(x, p)
        s = jnp.sum(xp, axis=1, keepdims=True)
        # 1/norm = exp(-log(sum)/p); negative/zero sums give NaN/inf exactly
        # like tensor.pow(1/p) with a float exponent.
        inv_norm = jnp.exp(jnp.log(s) * (-1.0 / p))
    # Re-read the tile (already resident in VMEM) for the final multiply so the
    # f32 upcast above is not kept live across the reduction for sub-f32
    # inputs (smaller working set -> larger tiles fit the VMEM budget).
    o_ref[...] = (x_ref[...].astype(jnp.float32) * inv_norm).astype(o_ref.dtype)


def _vmem_budget_bytes():
    # Per-generation scoped-VMEM budget: v5e/v6e (128 MiB physical) -> 64 MiB,
    # v7x (64 MiB physical) -> 32 MiB.
    try:
        cap = int(pltpu.get_tpu_info().vmem_capacity_bytes)
    except Exception:
        cap = 128 << 20
    return int(min(cap // 2, 64 << 20))


def _num_tensorcores():
    # Best-effort detection of parts exposing 2 TensorCores behind one device
    # (v4/v5p megacore, v7x). Perf heuristic only; correctness is unaffected.
    try:
        kind = jax.devices()[0].device_kind.lower()
    except Exception:
        return 1
    for tag in ("v4", "v5p", "7x"):
        if tag in kind:
            return 2
    return 1


def _choose_tile_rows(n_rows, d, itemsize, row_align, vmem_budget, num_cores):
    row_in_bytes = d * itemsize
    # Per grid step: double-buffered input + output tiles (4x tile bytes) plus
    # ~1.5 tiles worth of f32 intermediates inside the body.
    bytes_per_row = d * (4 * itemsize + 6)
    fit_rows = int(vmem_budget * 0.7) // max(bytes_per_row, 1)
    # Byte-targeted tile: ~4 MiB of input per grid step amortizes the ~0.35 us
    # per-step overhead on every generation while staying well inside VMEM.
    target_rows = (4 << 20) // max(row_in_bytes, 1)
    tile = min(fit_rows, target_rows)
    tile = max(row_align, (tile // row_align) * row_align)

    # Prefer >= 2 grid steps per TensorCore (software pipeline + megacore
    # sharding) as long as each step still moves >= 1 MiB of input.
    min_steps = 2 * max(1, num_cores)
    if _cdiv(n_rows, tile) < min_steps:
        cand = _round_up(_cdiv(n_rows, min_steps), row_align)
        if cand * row_in_bytes >= (1 << 20):
            tile = cand
    if tile >= n_rows:
        tile = n_rows  # tiny input: single full-array row block (always legal)
    return max(1, tile)


def normalize(x, power=2, tile_rows=None):
    """Row-wise L_p normalization of a [N, D] array: x / (sum_j x_j^p)^(1/p)."""
    if x.ndim != 2:
        raise ValueError("normalize expects a 2-D [batch, dim] array")
    N, D = x.shape
    out_dtype = x.dtype
    itemsize = jnp.dtype(out_dtype).itemsize
    # Sublane alignment of row blocks scales with dtype packing:
    # f32 -> 8, bf16/f16 -> 16, int8/fp8 -> 32.
    if itemsize >= 4:
        row_align = 8
    elif itemsize == 2:
        row_align = 16
    else:
        row_align = 32

    vmem_budget = _vmem_budget_bytes()
    if tile_rows is None:
        tile_rows = _choose_tile_rows(N, D, itemsize, row_align, vmem_budget,
                                      _num_tensorcores())
    else:
        tile_rows = max(row_align, _round_up(int(tile_rows), row_align))
        if tile_rows >= N:
            tile_rows = N

    grid = (_cdiv(N, tile_rows),)
    kernel = functools.partial(_normalize_kernel, power=power)

    # No padding, no output slicing: full-D lane block + Pallas-handled
    # partial trailing row block keep HBM traffic at the 2*N*D roofline.
    return pl.pallas_call(
        kernel,
        out_shape=jax.ShapeDtypeStruct((N, D), out_dtype),
        grid_spec=pltpu.PrefetchScalarGridSpec(
            num_scalar_prefetch=0,
            grid=grid,
            in_specs=[pl.BlockSpec((tile_rows, D), lambda i: (i, 0))],
            out_specs=pl.BlockSpec((tile_rows, D), lambda i: (i, 0)),
        ),
        compiler_params=pltpu.CompilerParams(
            dimension_semantics=("parallel",),
            vmem_limit_bytes=int(vmem_budget),
        ),
        cost_estimate=pl.CostEstimate(
            flops=3 * N * D,
            transcendentals=N,
            bytes_accessed=2 * N * D * itemsize,
        ),
    )(x)


if __name__ == "__main__":
    key = jax.random.PRNGKey(0)
    k1, k2, k3, k4 = jax.random.split(key, 4)

    def ref_normalize(x, p):
        xf = x.astype(jnp.float32)
        norm = jnp.power(
            jnp.sum(jnp.power(xf, float(p)), axis=1, keepdims=True),
            1.0 / float(p))
        return (xf / norm).astype(x.dtype)

    # lemniscate applies Normalize to [batch, low_dim] features (low_dim=128).
    x = jax.random.normal(k1, (8, 128), dtype=jnp.float32)
    out = jax.block_until_ready(normalize(x, power=2))
    assert out.shape == x.shape and out.dtype == x.dtype
    assert jnp.allclose(out, ref_normalize(x, 2), atol=1e-5, rtol=1e-5)

    # Ragged D (not a multiple of 128) and ragged N: full-D block, no padding.
    x2 = jax.random.normal(k2, (10, 32), dtype=jnp.float32)
    out2 = jax.block_until_ready(normalize(x2, power=2))
    assert out2.shape == x2.shape
    assert jnp.allclose(out2, ref_normalize(x2, 2), atol=1e-5, rtol=1e-5)

    # Partial trailing row block (grid > 1, N not a tile multiple, no pad/slice).
    x3 = jax.random.normal(k3, (20, 128), dtype=jnp.float32)
    out3 = jax.block_until_ready(normalize(x3, power=2, tile_rows=8))
    assert jnp.allclose(out3, ref_normalize(x3, 2), atol=1e-5, rtol=1e-5)

    # Generic integer p (multiply-chain path); positive inputs so the p-th
    # root is finite in both kernel and reference.
    x4 = jnp.abs(jax.random.normal(k4, (8, 128), dtype=jnp.float32)) + 0.1
    out4 = jax.block_until_ready(normalize(x4, power=3))
    assert jnp.allclose(out4, ref_normalize(x4, 3), atol=1e-4, rtol=1e-4)

    # bf16 path (tile is re-read for the final multiply instead of keeping the
    # f32 upcast live across the reduction).
    xb = jax.random.normal(k1, (24, 128), dtype=jnp.float32).astype(jnp.bfloat16)
    outb = jax.block_until_ready(normalize(xb, power=2))
    assert outb.dtype == jnp.bfloat16
    assert jnp.allclose(outb.astype(jnp.float32),
                        ref_normalize(xb, 2).astype(jnp.float32),
                        atol=2e-2, rtol=2e-2)

    # TODO(synk): like the PyTorch module, all-zero rows produce inf/NaN (no eps).
    print("KERNEL_OK")
</pallas_src>

<mosaic_0001>
module attributes {stable_mosaic.version = 11 : i64} {
  func.func @_normalize_kernel(%arg0: i32, %arg1: memref<8x128xf32, #tpu.memory_space<vmem>>, %arg2: memref<8x128xf32, #tpu.memory_space<vmem>>) attributes {dimension_semantics = [#tpu.dimension_semantics<parallel>], iteration_bounds = array<i64: 1>, scalar_prefetch = 0 : i64, scratch_operands = 0 : i64, tpu.core_type = #tpu.core_type<tc>, window_params = [{transform_indices = @transform_0, window_bounds = array<i64: 8, 128>}, {transform_indices = @transform_1, window_bounds = array<i64: 8, 128>}]} {
    %c0 = arith.constant 0 : index
    %c0_0 = arith.constant 0 : index
    %0 = vector.load %arg1[%c0, %c0_0] : memref<8x128xf32, #tpu.memory_space<vmem>>, vector<8x128xf32>
    %1 = arith.mulf %0, %0 : vector<8x128xf32>
    %cst = arith.constant dense<0.000000e+00> : vector<8xf32>
    %2 = vector.multi_reduction <add>, %1, %cst [1] : vector<8x128xf32> to vector<8xf32>
    %3 = vector.shape_cast %2 : vector<8xf32> to vector<8x1xf32>
    %4 = math.rsqrt %3 : vector<8x1xf32>
    %c0_1 = arith.constant 0 : index
    %c0_2 = arith.constant 0 : index
    %5 = vector.load %arg1[%c0_1, %c0_2] : memref<8x128xf32, #tpu.memory_space<vmem>>, vector<8x128xf32>
    %6 = vector.broadcast %4 : vector<8x1xf32> to vector<8x128xf32>
    %7 = arith.mulf %5, %6 : vector<8x128xf32>
    %c0_3 = arith.constant 0 : index
    %c0_4 = arith.constant 0 : index
    %8 = vector.load %arg2[%c0_3, %c0_4] : memref<8x128xf32, #tpu.memory_space<vmem>>, vector<8x128xf32>
    tpu.vector_store %arg2[%c0_3, %c0_4], %7 {strides = array<i32>} : memref<8x128xf32, #tpu.memory_space<vmem>>, vector<8x128xf32>,
    return
  }
  func.func @transform_0(%arg0: i32) -> (i32, i32) {
    %c0_i32 = arith.constant 0 : i32
    %c0_i32_0 = arith.constant 0 : i32
    return %arg0, %c0_i32 : i32, i32
  }
  func.func @transform_1(%arg0: i32) -> (i32, i32) {
    %c0_i32 = arith.constant 0 : i32
    %c0_i32_0 = arith.constant 0 : i32
    return %arg0, %c0_i32 : i32, i32
  }
}

</mosaic_0001>

<bundles_post_ra>
// kernel: tpu_custom_call.1
= control target key start
LH: loop header
LB: loop body
LE: loop exit
PB: predicated region body
PF: predicated region fallthrough
CT: control target
= control target key end

     0   :  { %6 = vsyncpa [#allocation3], 0  ;;  %s130_s0 = inlined_call_operand.hbm [shape: f32[8,128], index: 0, kind: input, shape index: {}]   ;;  %s131_s1 = inlined_call_operand.hbm [shape: f32[8,128], index: 1, kind: output, shape index: {}]  }
   0x1   :  { %7 = vsyncpa [#allocation4], 0  ;;  %s13_s8 = sshll.u32 %s130_s0, 4  ;;  %s112_s9 = smov [#allocation2]   ;;  %s14_s8 = int_to_ptr.hbm [resolvable:$true] %s13_s8 }
   0x2   :  { %s15_s10 = sshll.u32 %s112_s9, 4  ;;  %s16_s10 = int_to_ptr.vmem [resolvable:$true] %s15_s10 }
   0x3   :  { %18 = dma.hbm_to_vmem [thread:$0]  %s14_s8, 128, %s16_s10, [#allocation3]  }
   0x4   :  { %108 = dma.done.wait [#allocation3], 128  }
   0x5   :  { %109 = vsyncadd [#allocation3], 4294967168  ;;  %v23_v0 = vld [vmem:[#allocation2] sm:$0xff]  ;;  %s113_s0 = smov [#allocation5]   ;;  %s46_s14 = sshll.u32 %s131_s1, 4  ;;  %s47_s14 = int_to_ptr.hbm [resolvable:$true] %s46_s14 }
   0x6   :  { %v24_v1 = vmul.f32 %v23_v0, %v23_v0  ;;  %s44_s11 = sshll.u32 %s113_s0, 4  ;;  %s45_s11 = int_to_ptr.vmem [resolvable:$true] %s44_s11 }
   0x8   :  { %25 = vadd.xlane.f32.xlu0 %v24_v1 }
  0x7b   :  { %v26_v2 = vpop.xlane.xlu0 %25 }
  0x7c   :  { %58 = vrsqrt.f32 %v26_v2  ;;  %vm33_vm1 = vweird.f32 %v26_v2 }
  0x82   :  { %v59_v3 = vpop.eup %58 }
  0x83   :  { %v28_v4 = vmul.f32 %v59_v3, %v26_v2  ;;  %vm34_vm0 = vweird.f32 %v59_v3 }
  0x84   :  { %vm35_vm2 = vmor %vm33_vm1, %vm34_vm0 }
  0x85   :  { %v29_v5 = vmul.f32 %v59_v3, %v28_v4 }
  0x87   :  { %v30_v6 = vmul.f32 0.5, %v29_v5 }
  0x89   :  { %v31_v7 = vsub.f32 1.5, %v30_v6 }
  0x8b   :  { %v32_v8 = vmul.f32 %v59_v3, %v31_v7 }
  0x8d   :  { %v36_v9 = vsel %vm35_vm2, %v59_v3, %v32_v8 }
  0x8e   :  { %v37_v10 = vmul.f32 %v36_v9, %v23_v0 }
  0x90   :  { %38 = vst [vmem:[#allocation5] sm:$0xff] %v37_v10 }
  0x91   :  { %49 = dma.vmem_to_hbm [thread:$0]  %s45_s11, 128, %s47_s14, [#allocation4]  }
  0x92   :  { %110 = dma.done.wait [#allocation4], 128  }
  0x93   :  { %111 = vsyncadd [#allocation4], 4294967168 }
  0x94   :  { %54 = vsyncpa [#allocation3], 1 }
  0x95   :  { %55 = vsyncpa [#allocation4], 1 }

</bundles_post_ra>
